<compile_context>
chip_gen: v6e
topology: v6e:2x2x1
jax: 0.10.0
libtpu: 0.0.40
codegen_flags: <defaults>
</compile_context>

<pallas_src>
import functools

import jax
import jax.numpy as jnp
from jax.experimental import pallas as pl
from jax.experimental.pallas import tpu as pltpu


def _round_up(x, m):
    return (x + m - 1) // m * m


# --------------------- fused conv + ReLU + pool + FC kernel ------------------
def _fused_kernel(x_ref, wb_ref, bc_ref, wf_ref, bf_ref, o_ref, *scratch,
                  TH, n_h):
    # x_ref : (NB, Hp, LC)      lane-dense padded images (bf16), LC = Wp*C_in
    #                           zero-padded up to a multiple of 128 lanes
    # wb_ref: (3*LC, W*C_mid)   banded conv weight (bf16), all 9 taps in one K
    # bc_ref: (1, W*C_mid)      conv bias tiled over W (f32)
    # wf_ref: (W*C_mid, F_out)  fc weight tiled over W, pre-divided by H*W (f32)
    # bf_ref: (1, F_out)        fc bias (f32)
    # o_ref : (NB, 1, F_out)    output block
    # scratch: optional (NB, W*C_mid) f32 pooled-sum accumulator (only n_h > 1)
    NB = x_ref.shape[0]
    LC = x_ref.shape[2]
    WC = wb_ref.shape[1]
    F_out = bf_ref.shape[1]

    if n_h > 1:
        h = pl.program_id(1)
        r0 = pl.multiple_of(h * TH, TH)
    else:
        r0 = 0

    # In-kernel im2col without relayout: three row-shifted, lane-dense slabs
    # concatenated along lanes (each slab is a whole number of 128-lane groups),
    # then ONE MXU matmul against the banded weight (K = 3*LC).
    slabs = [x_ref[:, pl.ds(r0 + dh, TH), :] for dh in range(3)]  # 3 x (NB, TH, LC)
    patch = jnp.concatenate(slabs, axis=-1).reshape(NB * TH, 3 * LC)
    conv = jnp.dot(patch, wb_ref[...], preferred_element_type=jnp.float32)
    conv = jnp.maximum(conv + bc_ref[...], 0.0)          # bias + ReLU (f32, v5e-safe)
    part = conv.reshape(NB, TH, WC).sum(axis=1)          # (NB, WC) pooled partial sum

    def _fc(pooled_sum):
        # AdaptiveAvgPool2d(1) + flatten + Linear: 1/(H*W) and the W-collapse are
        # folded into wf; exact-f32 epilogue on the VPU (avoids M=1 MXU drain).
        out = jnp.sum(pooled_sum[:, :, None] * wf_ref[...][None, :, :], axis=1)
        return (out + bf_ref[...]).reshape(NB, 1, F_out).astype(o_ref.dtype)

    if n_h == 1:
        # single spatial step: no accumulator, no init/finalize bookkeeping
        o_ref[...] = _fc(part)
    else:
        acc_ref = scratch[0]

        @pl.when(h == 0)
        def _init():
            acc_ref[...] = jnp.zeros_like(acc_ref)

        acc_ref[...] += part

        @pl.when(h == n_h - 1)
        def _finalize():
            o_ref[...] = _fc(acc_ref[...])


# --------------------------------- wrapper -----------------------------------
def feature_extractor_forward(x_nchw, params):
    """x: (N, C_in, H, W) f32 -> (N, F_out) f32."""
    N, C_in, H, W = x_nchw.shape
    C_mid = params["w_conv"].shape[0]
    F_out = params["w_fc"].shape[0]
    Hp, Wp = H + 2, W + 2
    WC = W * C_mid
    LC = _round_up(Wp * C_in, 128)        # lane-dense + vreg-aligned minor dim

    # ---- NB images per grid step (keep >= 2 parallel steps for v7x's 2 TCs) -
    divs = [d for d in range(1, min(8, N) + 1) if N % d == 0]
    pref = [d for d in divs if N // d >= 2]
    NB = max(pref) if pref else max(divs)

    # ---- spatial tiling: only tile rows if per-step intermediates get large -
    TH = H
    while TH % 2 == 0 and NB * TH * (3 * LC * 2 + WC * 4) > (8 << 20):
        TH //= 2
    n_h = H // TH

    # ---- layout-only input glue (single fused pad+reshape+cast) -------------
    # TODO(synk): mask the 1-px border in-kernel to avoid this HBM round trip.
    x_pad = jnp.pad(x_nchw, ((0, 0), (0, 0), (1, 1), (1, 1)))
    x_pad = x_pad.transpose(0, 2, 3, 1).reshape(N, Hp, Wp * C_in)
    x_pad = jnp.pad(x_pad, ((0, 0), (0, 0), (0, LC - Wp * C_in)))
    x_pad = x_pad.astype(jnp.bfloat16)                               # (N, Hp, LC)

    # ---- banded conv weight: ONE matmul covers all 9 taps for a row tile ----
    # w_band[dh*LC + (w+dw)*C_in + c, w*C_mid + m] = w_conv[m, c, dh, dw]
    taps = jnp.transpose(params["w_conv"], (2, 3, 1, 0))             # (3,3,Cin,Cmid)
    blocks = []
    for dh in range(3):
        blk = jnp.zeros((Wp, C_in, W, C_mid), jnp.float32)
        for dw in range(3):
            sel = jnp.eye(W, Wp, k=dw, dtype=jnp.float32)            # sel[w, w+dw]=1
            blk = blk + jnp.einsum("wv,cm->vcwm", sel, taps[dh, dw])
        blk = blk.reshape(Wp * C_in, WC)
        blk = jnp.pad(blk, ((0, LC - Wp * C_in), (0, 0)))
        blocks.append(blk)
    w_band = jnp.concatenate(blocks, axis=0).astype(jnp.bfloat16)    # (3*LC, WC)

    b_conv_t = jnp.tile(params["b_conv"], W).reshape(1, WC).astype(jnp.float32)
    # FC weight tiled over W with the average-pool 1/(H*W) folded in.
    w_fc_t = (jnp.tile(params["w_fc"].T, (W, 1)) / float(H * W)).astype(jnp.float32)
    b_fc = params["b_fc"].reshape(1, F_out).astype(jnp.float32)

    kernel = functools.partial(_fused_kernel, TH=TH, n_h=n_h)

    # ---- VMEM budget from actual block bytes (not a hardcoded 32 MiB) -------
    img_bytes = NB * _round_up(Hp, 16) * LC * 2                      # bf16 image blk
    wgt_bytes = (3 * LC) * _round_up(WC, 128) * 2 \
        + (_round_up(WC, 8) + 16) * _round_up(F_out, 128) * 4
    step_bytes = _round_up(NB * TH, 8) * (3 * LC * 2 + _round_up(WC, 128) * 4)
    working = 2 * img_bytes + 2 * wgt_bytes + 2 * step_bytes + (1 << 20)
    vmem_limit = int(min(128 << 20, max(32 << 20, working)))

    scratch_shapes = [] if n_h == 1 else [pltpu.VMEM((NB, WC), jnp.float32)]

    out = pl.pallas_call(
        kernel,
        out_shape=jax.ShapeDtypeStruct((N, 1, F_out), jnp.float32),
        grid=(N // NB, n_h),
        in_specs=[
            # whole lane-dense padded image batch; block index constant along h
            # (resident across the pooling reduction, re-DMAed only per n step).
            # If VMEM-bound on v7x, add pipeline_mode=pl.Buffered(1) here.
            pl.BlockSpec((NB, Hp, LC), lambda n, h: (n, 0, 0)),
            pl.BlockSpec((3 * LC, WC), lambda n, h: (0, 0)),
            pl.BlockSpec((1, WC), lambda n, h: (0, 0)),
            pl.BlockSpec((WC, F_out), lambda n, h: (0, 0)),
            pl.BlockSpec((1, F_out), lambda n, h: (0, 0)),
        ],
        out_specs=pl.BlockSpec((NB, 1, F_out), lambda n, h: (n, 0, 0)),
        scratch_shapes=scratch_shapes,
        compiler_params=pltpu.CompilerParams(
            dimension_semantics=("parallel", "arbitrary"),
            vmem_limit_bytes=vmem_limit,
        ),
    )(x_pad, w_band, b_conv_t, w_fc_t, b_fc)

    return out.reshape(N, F_out)


# ------------------------------ reference (JAX) -------------------------------
def reference_forward(x, params):
    # match the kernel's bf16 MXU operands so only accumulation order differs
    xb = x.astype(jnp.bfloat16).astype(jnp.float32)
    wb = params["w_conv"].astype(jnp.bfloat16).astype(jnp.float32)
    y = jax.lax.conv_general_dilated(
        xb, wb, window_strides=(1, 1), padding=((1, 1), (1, 1)),
        dimension_numbers=("NCHW", "OIHW", "NCHW"))
    y = jnp.maximum(y + params["b_conv"][None, :, None, None], 0.0)
    pooled = jnp.mean(y, axis=(2, 3))                     # AdaptiveAvgPool2d(1)+flatten
    return pooled @ params["w_fc"].T + params["b_fc"][None, :]


def init_params(key, c_in=4, c_mid=8, f_out=32):
    k1, k2, k3, k4 = jax.random.split(key, 4)
    return {
        "w_conv": 0.1 * jax.random.normal(k1, (c_mid, c_in, 3, 3), jnp.float32),
        "b_conv": 0.1 * jax.random.normal(k2, (c_mid,), jnp.float32),
        "w_fc":   0.1 * jax.random.normal(k3, (f_out, c_mid), jnp.float32),
        "b_fc":   0.1 * jax.random.normal(k4, (f_out,), jnp.float32),
    }


if __name__ == "__main__":
    key = jax.random.PRNGKey(0)
    kx, kp = jax.random.split(key)

    N, C, H, W = 2, 4, 16, 16
    x = jax.random.normal(kx, (N, C, H, W), jnp.float32)
    params = init_params(kp, c_in=C, c_mid=8, f_out=32)

    y = feature_extractor_forward(x, params)
    jax.block_until_ready(y)
    assert y.shape == (N, 32) and y.dtype == jnp.float32

    y_ref = reference_forward(x, params)
    err = float(jnp.max(jnp.abs(y - y_ref)))
    assert jnp.allclose(y, y_ref, atol=2e-3, rtol=2e-3), f"mismatch: max abs err {err}"

    print("KERNEL_OK")
</pallas_src>

<mosaic_0001>
module attributes {stable_mosaic.version = 11 : i64} {
  func.func @_fused_kernel(%arg0: i32, %arg1: i32, %arg2: memref<1x18x128xbf16, #tpu.memory_space<vmem>>, %arg3: memref<384x128xbf16, #tpu.memory_space<vmem>>, %arg4: memref<1x128xf32, #tpu.memory_space<vmem>>, %arg5: memref<128x32xf32, #tpu.memory_space<vmem>>, %arg6: memref<1x32xf32, #tpu.memory_space<vmem>>, %arg7: memref<1x1x32xf32, #tpu.memory_space<vmem>>) attributes {dimension_semantics = [#tpu.dimension_semantics<parallel>, #tpu.dimension_semantics<arbitrary>], iteration_bounds = array<i64: 2, 1>, scalar_prefetch = 0 : i64, scratch_operands = 0 : i64, tpu.core_type = #tpu.core_type<tc>, window_params = [{transform_indices = @transform_0, window_bounds = array<i64: 1, 18, 128>}, {pipeline_mode = #tpu.pipeline_mode<synchronous>, transform_indices = @transform_1, window_bounds = array<i64: 384, 128>}, {pipeline_mode = #tpu.pipeline_mode<synchronous>, transform_indices = @transform_2, window_bounds = array<i64: 1, 128>}, {pipeline_mode = #tpu.pipeline_mode<synchronous>, transform_indices = @transform_3, window_bounds = array<i64: 128, 32>}, {pipeline_mode = #tpu.pipeline_mode<synchronous>, transform_indices = @transform_4, window_bounds = array<i64: 1, 32>}, {transform_indices = @transform_5, window_bounds = array<i64: 1, 1, 32>}]} {
    %c0 = arith.constant 0 : index
    %c0_0 = arith.constant 0 : index
    %c0_1 = arith.constant 0 : index
    %0 = vector.load %arg2[%c0, %c0_0, %c0_1] : memref<1x18x128xbf16, #tpu.memory_space<vmem>>, vector<1x16x128xbf16>
    %c0_2 = arith.constant 0 : index
    %c1 = arith.constant 1 : index
    %c0_3 = arith.constant 0 : index
    %1 = vector.load %arg2[%c0_2, %c1, %c0_3] : memref<1x18x128xbf16, #tpu.memory_space<vmem>>, vector<1x16x128xbf16>
    %c0_4 = arith.constant 0 : index
    %c2 = arith.constant 2 : index
    %c0_5 = arith.constant 0 : index
    %2 = vector.load %arg2[%c0_4, %c2, %c0_5] : memref<1x18x128xbf16, #tpu.memory_space<vmem>>, vector<1x16x128xbf16>
    %3 = tpu.concatenate %0, %1, %2 in 2 : vector<1x16x128xbf16>, vector<1x16x128xbf16>, vector<1x16x128xbf16> -> vector<1x16x384xbf16>
    %4 = vector.shape_cast %3 : vector<1x16x384xbf16> to vector<16x384xbf16>
    %c0_6 = arith.constant 0 : index
    %c0_7 = arith.constant 0 : index
    %5 = vector.load %arg3[%c0_6, %c0_7] : memref<384x128xbf16, #tpu.memory_space<vmem>>, vector<384x128xbf16>
    %cst = arith.constant dense<0.000000e+00> : vector<16x128xf32>
    %6 = tpu.matmul %4, %5, %cst {dimension_numbers = #tpu.dot_dimension_numbers<[1], [0], [0], [1], [0, 0, 1, 1], [], []>} : vector<16x384xbf16>, vector<384x128xbf16>, vector<16x128xf32> -> vector<16x128xf32>
    %c0_8 = arith.constant 0 : index
    %c0_9 = arith.constant 0 : index
    %7 = vector.load %arg4[%c0_8, %c0_9] : memref<1x128xf32, #tpu.memory_space<vmem>>, vector<1x128xf32>
    %8 = vector.broadcast %7 : vector<1x128xf32> to vector<16x128xf32>
    %9 = arith.addf %6, %8 : vector<16x128xf32>
    %cst_10 = arith.constant 0.000000e+00 : f32
    %10 = vector.broadcast %cst_10 : f32 to vector<16x128xf32>
    %11 = arith.maximumf %9, %10 : vector<16x128xf32>
    %12 = vector.shape_cast %11 : vector<16x128xf32> to vector<1x16x128xf32>
    %cst_11 = arith.constant dense<0.000000e+00> : vector<1x128xf32>
    %13 = vector.multi_reduction <add>, %12, %cst_11 [1] : vector<1x16x128xf32> to vector<1x128xf32>
    %14 = vector.shape_cast %13 : vector<1x128xf32> to vector<1x128x1xf32>
    %c0_12 = arith.constant 0 : index
    %c0_13 = arith.constant 0 : index
    %15 = vector.load %arg5[%c0_12, %c0_13] : memref<128x32xf32, #tpu.memory_space<vmem>>, vector<128x32xf32>
    %16 = vector.shape_cast %15 : vector<128x32xf32> to vector<1x128x32xf32>
    %17 = vector.broadcast %14 : vector<1x128x1xf32> to vector<1x128x32xf32>
    %18 = arith.mulf %17, %16 : vector<1x128x32xf32>
    %cst_14 = arith.constant dense<0.000000e+00> : vector<1x32xf32>
    %19 = vector.multi_reduction <add>, %18, %cst_14 [1] : vector<1x128x32xf32> to vector<1x32xf32>
    %c0_15 = arith.constant 0 : index
    %c0_16 = arith.constant 0 : index
    %20 = vector.load %arg6[%c0_15, %c0_16] : memref<1x32xf32, #tpu.memory_space<vmem>>, vector<1x32xf32>
    %21 = arith.addf %19, %20 : vector<1x32xf32>
    %22 = vector.shape_cast %21 : vector<1x32xf32> to vector<1x1x32xf32>
    %c0_17 = arith.constant 0 : index
    %c0_18 = arith.constant 0 : index
    %c0_19 = arith.constant 0 : index
    %23 = vector.load %arg7[%c0_17, %c0_18, %c0_19] : memref<1x1x32xf32, #tpu.memory_space<vmem>>, vector<1x1x32xf32>
    tpu.vector_store %arg7[%c0_17, %c0_18, %c0_19], %22 {strides = array<i32>} : memref<1x1x32xf32, #tpu.memory_space<vmem>>, vector<1x1x32xf32>,
    return
  }
  func.func @transform_0(%arg0: i32, %arg1: i32) -> (i32, i32, i32) {
    %c0_i32 = arith.constant 0 : i32
    %c0_i32_0 = arith.constant 0 : i32
    %c0_i32_1 = arith.constant 0 : i32
    return %arg0, %c0_i32, %c0_i32_0 : i32, i32, i32
  }
  func.func @transform_1(%arg0: i32, %arg1: i32) -> (i32, i32) {
    %c0_i32 = arith.constant 0 : i32
    %c0_i32_0 = arith.constant 0 : i32
    %c0_i32_1 = arith.constant 0 : i32
    return %c0_i32, %c0_i32_0 : i32, i32
  }
  func.func @transform_2(%arg0: i32, %arg1: i32) -> (i32, i32) {
    %c0_i32 = arith.constant 0 : i32
    %c0_i32_0 = arith.constant 0 : i32
    %c0_i32_1 = arith.constant 0 : i32
    return %c0_i32, %c0_i32_0 : i32, i32
  }
  func.func @transform_3(%arg0: i32, %arg1: i32) -> (i32, i32) {
    %c0_i32 = arith.constant 0 : i32
    %c0_i32_0 = arith.constant 0 : i32
    %c0_i32_1 = arith.constant 0 : i32
    return %c0_i32, %c0_i32_0 : i32, i32
  }
  func.func @transform_4(%arg0: i32, %arg1: i32) -> (i32, i32) {
    %c0_i32 = arith.constant 0 : i32
    %c0_i32_0 = arith.constant 0 : i32
    %c0_i32_1 = arith.constant 0 : i32
    return %c0_i32, %c0_i32_0 : i32, i32
  }
  func.func @transform_5(%arg0: i32, %arg1: i32) -> (i32, i32, i32) {
    %c0_i32 = arith.constant 0 : i32
    %c0_i32_0 = arith.constant 0 : i32
    %c0_i32_1 = arith.constant 0 : i32
    return %arg0, %c0_i32, %c0_i32_0 : i32, i32, i32
  }
}

</mosaic_0001>

<bundles_post_ra>
// kernel: tpu_custom_call.1
= control target key start
LH: loop header
LB: loop body
LE: loop exit
PB: predicated region body
PF: predicated region fallthrough
CT: control target
= control target key end

     0   :  { %10 = vsyncpa [#allocation3], 0  ;;  %s1304_s0 = inlined_call_operand.vmem [shape: bf16[2,18,128], index: 0, kind: input, shape index: {}]   ;;  %s1305_s1 = inlined_call_operand.vmem [shape: bf16[384,128], index: 1, kind: input, shape index: {}]   ;;  %s1306_s2 = inlined_call_operand.vmem [shape: f32[1,128], index: 2, kind: input, shape index: {}]   ;;  %s1307_s3 = inlined_call_operand.vmem [shape: f32[128,32], index: 3, kind: input, shape index: {}]   ;;  %s1308_s4 = inlined_call_operand.vmem [shape: f32[1,32], index: 4, kind: input, shape index: {}]   ;;  %s1309_s5 = inlined_call_operand.hbm [shape: f32[2,1,32], index: 5, kind: output, shape index: {}]  }
   0x1   :  { %12 = vsyncpa [#allocation3 + $0x1], 0  ;;  %s1054_s18 = smov 0   ;;  %s1056_s19 = smov 0  }
   0x2   :  { %s1058_s20 = smov 0   ;;  %s1060_s21 = smov 0  }
   0x3   :  { %s1062_s22 = smov 0   ;;  %s1064_s23 = smov 0  }
   0x4 LB: > { %s770_s24 = sadd.s32 4294967295, %s1019_s23   ;;  %s771_s25 = sadd.s32 4294967294, %s1019_s23   ;;  %s1019_s23 = sphi %s1064_s23, %s18_s23   ;;  %s1015_s22 = sphi %s1062_s22, %s1316_s22   ;;  %s1011_s21 = sphi %s1060_s21, %s1315_s21   ;;  %s1007_s20 = sphi %s1058_s20, %s1314_s20   ;;  %s1003_s19 = sphi %s1056_s19, %s1313_s19   ;;  %s999_s18 = sphi %s1054_s18, %s1312_s18  }
   0x5   : > { %s30_s26 = sadd.s32 1, %s1015_s22  ;;  %s147_s27 = sadd.s32 1, %s1007_s20 }
   0x6   : > { %p32_p0 = scmp.ge.s32.totalorder %s30_s26, 2  ;;  %p157_p1 = scmp.ne.s32.totalorder %s1007_s20, %s1003_s19 }
   0x7   : > { %p158_p2 = scmp.eq.s32.totalorder %s770_s24, 1  ;;  %p163_p3 = scmp.ne.s32.totalorder %s1003_s19, %s999_s18 }
   0x8   : > { %s1318_s26 = smov (%p32_p0, %s30_s26), 0  ;;  %p164_p5 = scmp.eq.s32.totalorder %s771_s25, 1 }
   0x9   : > { %p1094_p4 = por %p158_p2, %p157_p1  ;;  %s144_s29 = ssub.s32 %s1015_s22, %s1318_s26 }
   0xa   : > { %p774_p6 = scmp.ge.s32.totalorder %s1019_s23, 1  ;;  %p145_p7 = scmp.eq.s32.totalorder %s144_s29, 0 }
   0xb   : > { %p1101_p8 = por %p164_p5, %p163_p3  ;;  %p202_p9 = scmp.lt.s32.totalorder %s1019_s23, 3 }
   0xc   : > { %s1107_s6 = scalar_select %p145_p7, %s1007_s20, %s147_s27  }
   0xd   : > { %p203_p10 = pnand %p774_p6, %p202_p9 }
   0xe   : > { %p229_p11 = scmp.lt.s32.totalorder (!%p203_p10), %s1011_s21, 1  ;;  %s804_s7 = sshll.u32 (!%p203_p10), %s1011_s21, 4 }
   0xf   : > { %206 = sbr.rel (%p203_p10) target bundleno = 453 (0x1c5), region = 40  ;;  %s708_s12 = scalar_lea.hbm (!%p203_p10), %s1309_s5, %s804_s7 }
  0x10   : > { %s1023_s15 = smov (!%p203_p10), [#allocation2]  }
  0x11   : > { %s947_s16 = sshll.u32 (!%p203_p10), %s1023_s15, 4  ;;  %s948_s16 = int_to_ptr.vmem [resolvable:$false] %s947_s16 }
  0x14   : > { %v916_v0 = vld [vmem:[%s1305_s1 + $0x78] sm:$0xff]   ;;  %v1021_v1 = vmov 0.0   ;;  %v919_v4 = vld [vmem:[%s1305_s1 + $0x70] sm:$0xff]   ;;  %vm1022_vm0 = vmmov 0   ;;  %v922_v7 = vld [vmem:[%s1305_s1 + $0x68] sm:$0xff]   ;;  %s230_s24 = scalar_select %p229_p11, %s1011_s21, 1 }
  0x15   : > { %838 = vmatprep.subr.bf16.mxu1 %v1021_v1  ;;  %v917_v2 = vld [vmem:[%s1305_s1 + $0x38] sm:$0xff]   ;;  %807 = vmatprep.subr.bf16.mxu0 %v916_v0  ;;  %v920_v5 = vld [vmem:[%s1305_s1 + $0x30] sm:$0xff]   ;;  %v923_v8 = vld [vmem:[%s1305_s1 + $0x28] sm:$0xff]   ;;  %vm265_vm1 = vcmask 1046528   ;;  %vm248_vm2 = vsmask.f32 7424 }
  0x16   : > { %v918_v3 = vld [vmem:[%s1305_s1 + $0xb8] sm:$0xff]   ;;  %808 = vmatpush3.bf16.msra.mxu0 %v917_v2  ;;  %854 = vmatprep.mubr.msk.bf16.mxu1 %vm1022_vm0, %v1021_v1  ;;  %v921_v6 = vld [vmem:[%s1305_s1 + $0xb0] sm:$0xff]   ;;  %v924_v9 = vld [vmem:[%s1305_s1 + $0xa8] sm:$0xff]   ;;  %s858_s10 = smul.u32 12, %s230_s24  ;;  %vm655_vm3 = vcmask 261120   ;;  %s227_s24 = sand.u32 1, %s1003_s19  }
  0x17   : > { %839 = vmatpush3.bf16.msra.mxu1 %v918_v3  ;;  %809 = vmatprep.subr.bf16.mxu0 %v919_v4  ;;  %v925_v10 = vld [vmem:[%s1305_s1 + $0x60] sm:$0xff]   ;;  %v928_v13 = vld [vmem:[%s1305_s1 + $0x58] sm:$0xff]   ;;  %v931_v16 = vld [vmem:[%s1305_s1 + $0x50] sm:$0xff]   ;;  %s228_s8 = scalar_lea.vmem [#allocation2], %s227_s24  ;;  %vm695_vm4 = vcmask 253952   ;;  %s698_s13 = scalar_lea.sflag [#allocation3], %s227_s24 }
  0x18   : > { %840 = vmatprep.subr.bf16.mxu1 %v1021_v1  ;;  %v926_v11 = vld [vmem:[%s1305_s1 + $0x20] sm:$0xff]   ;;  %v929_v14 = vld [vmem:[%s1305_s1 + $0x18] sm:$0xff]   ;;  %v932_v17 = vld [vmem:[%s1305_s1 + $0x10] sm:$0xff]   ;;  %s233_s29 = scalar_lea.vmem %s1304_s0, %s858_s10  ;;  %s710_s9 = sshll.u32 %s228_s8, 4  ;;  %s711_s9 = int_to_ptr.vmem [resolvable:$true] %s710_s9 }
  0x19   : > { %v927_v12 = vld [vmem:[%s1305_s1 + $0xa0] sm:$0xff]   ;;  %v930_v15 = vld [vmem:[%s1305_s1 + $0x98] sm:$0xff]   ;;  %v933_v18 = vld [vmem:[%s1305_s1 + $0x90] sm:$0xff]   ;;  %s943_s14 = scalar_lea.vmem %s711_s9, 16  ;;  %s949_s21 = scalar_lea.vmem %s948_s16, 32 }
  0x1a   : > { %810 = vmatpush3.bf16.msra.mxu0 %v920_v5  ;;  %v934_v19 = vld [vmem:[%s1305_s1 + $0x48] sm:$0xff]   ;;  %v937_v22 = vld [vmem:[%s1305_s1 + $0x40] sm:$0xff]   ;;  %v625_v4 = vld [vmem:[%s1307_s3 + $0x10] sm:$0xff]  ;;  %p944_p12 = scmp.ne.s32.totalorder %s711_s9, %s943_s14  ;;  %p950_p1 = scmp.lt.s32.totalorder %s711_s9, %s948_s16 }
  0x1b   : > { %841 = vmatpush3.bf16.msra.mxu1 %v921_v6  ;;  %811 = vmatprep.subr.bf16.mxu0 %v922_v7  ;;  %v935_v20 = vld [vmem:[%s1305_s1 + $0x8] sm:$0xff]   ;;  %v235_v23 = vld [vmem:[%s233_s29] sm:$0xf]  ;;  %v236_v24 = vld [vmem:[%s233_s29 + $0x4] sm:$0xf]  ;;  %p951_p2 = scmp.lt.s32.totalorder %s949_s21, %s943_s14 }
  0x1c   : > { %842 = vmatprep.subr.bf16.mxu1 %v1021_v1  ;;  %v936_v21 = vld [vmem:[%s1305_s1 + $0x88] sm:$0xff]   ;;  %v776_v25 = vcombine.low %v235_v23, %v236_v24  ;;  %v238_v27 = vld [vmem:[%s233_s29] sm:$0xe]  ;;  %v779_v43 = vld [vmem:[%s1306_s2] ss:$0 sm:$0xff]  ;;  %p945_p13 = pnand %p944_p12, %p1094_p4 }
  0x1d   : > { %v941_v26 = vld [vmem:[%s233_s29 + $0x8] ss:$0 sps:$4 sm:$0x11]   ;;  %v938_v28 = vld [vmem:[%s1305_s1] sm:$0xff]   ;;  %v778_v32 = vcombine.low %v238_v27, %v236_v24  ;;  %v626_v7 = vld [vmem:[%s1307_s3 + $0x18] sm:$0xff]  ;;  %p952_p3 = por %p951_p2, %p950_p1 }
  0x1e   : > { %812 = vmatpush3.bf16.msra.mxu0 %v923_v8  ;;  %v250_v29 = vshrl.u32 %v776_v25, 16  ;;  %v252_v30 = vshll.u32 %v776_v25, 16  ;;  %v257_v31 = vshll.u32 %v941_v26, 16  ;;  %v939_v33 = vld [vmem:[%s1305_s1 + $0x80] sm:$0xff]   ;;  %v267_v34 = vrot.slane %v941_v26, 1  ;;  %v624_v5 = vld [vmem:[%s1307_s3 + $0x8] sm:$0xff]  ;;  %p946_p0 = pneg %p945_p13 }
  0x1f   : > { %843 = vmatpush3.bf16.msra.mxu1 %v924_v9  ;;  %813 = vmatprep.subr.bf16.mxu0 %v925_v10  ;;  %v266_v37 = vrot.slane %v778_v32, 1  ;;  %v623_v2 = vld [vmem:[%s1307_s3] sm:$0xff]  ;;  %v629_v23 = vld [vmem:[%s1307_s3 + $0x30] sm:$0xff]  ;;  %v630_v27 = vld [vmem:[%s1307_s3 + $0x38] sm:$0xff] }
  0x20   : > { %844 = vmatprep.subr.bf16.mxu1 %v1021_v1  ;;  %v254_v35 = vrot.slane %v252_v30, 1  ;;  %v259_v36 = vrot.slane %v257_v31, 1  ;;  %p953_p5 = pnand %p952_p3, %p946_p0 }
  0x21   : > { %v268_v39 = vsel %vm265_vm1, %v266_v37, %v267_v34  ;;  %v632_v37 = vld [vmem:[%s1307_s3 + $0x48] sm:$0xff] }
  0x22   : > { %814 = vmatpush3.bf16.msra.mxu0 %v926_v11  ;;  %v255_v38 = vor.u32 %v254_v35, %v250_v29 }
  0x23   : > { %845 = vmatpush3.bf16.msra.mxu1 %v927_v12  ;;  %815 = vmatprep.subr.bf16.mxu0 %v928_v13  ;;  %v627_v12 = vld [vmem:[%s1307_s3 + $0x20] sm:$0xff] }
  0x24   : > { %846 = vmatprep.subr.bf16.mxu1 %v1021_v1  ;;  %v260_v40 = vsel %vm248_vm2, %v255_v38, %v259_v36 }
  0x25   : > { %501 = vmatprep.mubr.bf16.mxu0 %v260_v40 }
  0x26   : > { %816 = vmatpush3.bf16.msra.mxu0 %v929_v14 }
  0x27   : > { %847 = vmatpush3.bf16.msra.mxu1 %v930_v15  ;;  %817 = vmatprep.subr.bf16.mxu0 %v931_v16 }
  0x28   : > { %848 = vmatprep.subr.bf16.mxu1 %v1021_v1 }
  0x2a   : > { %818 = vmatpush3.bf16.msra.mxu0 %v932_v17  ;;  %v628_v17 = vld [vmem:[%s1307_s3 + $0x28] sm:$0xff] }
  0x2b   : > { %849 = vmatpush3.bf16.msra.mxu1 %v933_v18  ;;  %819 = vmatprep.subr.bf16.mxu0 %v934_v19 }
  0x2c   : > { %850 = vmatprep.subr.bf16.mxu1 %v1021_v1 }
  0x2e   : > { %820 = vmatpush3.bf16.msra.mxu0 %v935_v20 }
  0x2f   : > { %851 = vmatpush3.bf16.msra.mxu1 %v936_v21  ;;  %821 = vmatprep.subr.bf16.mxu0 %v937_v22 }
  0x30   : > { %852 = vmatprep.subr.bf16.mxu1 %v1021_v1 }
  0x32   : > { %822 = vmatpush3.bf16.msra.mxu0 %v938_v28 }
  0x33   : > { %853 = vmatpush3.bf16.msra.mxu1 %v939_v33  ;;  %v631_v33 = vld [vmem:[%s1307_s3 + $0x40] sm:$0xff] }
  0x35   : > { %502 = vmatmul.mubr.bf16.vlgmr.msra.gmra.mxu0 %v776_v25 }
  0x36   : > { %855 = vmatmul.mubr.bf16.vlgmr.msra.gmra.mxu1 %v268_v39 }
  0xf5   : > { %v823_v41 = vpop.f32.mrf.mxu0 }
  0xf6   : > { %v544_v42 = vpop.f32.mrf.mxu1 }
  0xf7   : > { %v824_v44 = vpop.f32.mrf.mxu0 }
  0xf8   : > { %v856_v45 = vpop.f32.mrf.mxu1  ;;  %v825_v46 = vadd.f32 %v824_v44, %v823_v41 }
  0xf9   : > { %v826_v47 = vpop.f32.mrf.mxu0 }
  0xfa   : > { %v547_v48 = vpop.f32.mrf.mxu1  ;;  %v504_v49 = vadd.f32 %v825_v46, %v779_v43 }
  0xfb   : > { %v827_v50 = vpop.f32.mrf.mxu0 }
  0xfc   : > { %v857_v51 = vpop.f32.mrf.mxu1  ;;  %v828_v52 = vadd.f32 %v827_v50, %v826_v47  ;;  %v545_v53 = vadd.f32 %v544_v42, %v504_v49  ;;  %v634_v47 = vld [vmem:[%s1307_s3 + $0x58] sm:$0xff] }
  0xfe   : > { %v507_v54 = vadd.f32 %v828_v52, %v779_v43  ;;  %v551_v56 = vmax.f32 %v545_v53, 0.0  ;;  %v633_v43 = vld [vmem:[%s1307_s3 + $0x50] sm:$0xff]  ;;  %v635_v53 = vld [vmem:[%s1307_s3 + $0x60] sm:$0xff] }
 0x100   : > { %v548_v55 = vadd.f32 %v547_v48, %v507_v54 }
 0x102   : > { %v552_v57 = vmax.f32 %v548_v55, 0.0 }
 0x104   : > { %v553_v58 = vadd.f32 %v552_v57, %v551_v56  ;;  %v636_v57 = vld [vmem:[%s1307_s3 + $0x68] sm:$0xff] }
 0x106   : > { %v554_v59 = vrot.slane %v553_v58, 4 }
 0x108   : > { %v555_v60 = vadd.f32 %v554_v59, %v553_v58 }
 0x10a   : > { %v556_v61 = vrot.slane %v555_v60, 2 }
 0x10c   : > { %v557_v62 = vadd.f32 %v556_v61, %v555_v60 }
 0x10e   : > { %v558_v63 = vrot.slane %v557_v62, 1 }
 0x110   : > { %v559_v0 = vadd.f32 %v558_v63, %v557_v62  ;;  %v637_v63 = vld [vmem:[%s1307_s3 + $0x70] sm:$0xff] }
 0x112   : > { %569 = vbcast.lane.b32.xlu1 %v559_v0, 272  ;;  %561 = vbcast.lane.b32.xlu0 %v559_v0, 256 }
 0x116   : > { %573 = vbcast.lane.b32.xlu1 %v559_v0, 280  ;;  %565 = vbcast.lane.b32.xlu0 %v559_v0, 264 }
 0x11a   : > { %581 = vbcast.lane.b32.xlu1 %v559_v0, 296  ;;  %577 = vbcast.lane.b32.xlu0 %v559_v0, 288 }
 0x11e   : > { %589 = vbcast.lane.b32.xlu1 %v559_v0, 312  ;;  %585 = vbcast.lane.b32.xlu0 %v559_v0, 304 }
 0x122   : > { %597 = vbcast.lane.b32.xlu1 %v559_v0, 328  ;;  %593 = vbcast.lane.b32.xlu0 %v559_v0, 320 }
 0x126   : > { %605 = vbcast.lane.b32.xlu1 %v559_v0, 344  ;;  %601 = vbcast.lane.b32.xlu0 %v559_v0, 336 }
 0x12a   : > { %613 = vbcast.lane.b32.xlu1 %v559_v0, 360  ;;  %609 = vbcast.lane.b32.xlu0 %v559_v0, 352 }
 0x12e   : > { %621 = vbcast.lane.b32.xlu1 %v559_v0, 376  ;;  %617 = vbcast.lane.b32.xlu0 %v559_v0, 368 }
 0x184   : > { %v570_v1 = vpop.permute.xlu1 %569  ;;  %v562_v3 = vpop.permute.xlu0 %561 }
 0x185   : > { %v639_v6 = vmul.f32 %v623_v2, %v562_v3  ;;  %v641_v10 = vmul.f32 %v625_v4, %v570_v1  ;;  %v638_v3 = vld [vmem:[%s1307_s3 + $0x78] sm:$0xff] }
 0x187   : > { %v656_v13 = vsel %vm655_vm3, %v639_v6, 0.0  ;;  %v659_v20 = vsel %vm655_vm3, %v641_v10, 0.0 }
 0x188   : > { %v574_v8 = vpop.permute.xlu1 %573  ;;  %v566_v9 = vpop.permute.xlu0 %565 }
 0x189   : > { %v640_v11 = vmul.f32 %v624_v5, %v566_v9  ;;  %v642_v14 = vmul.f32 %v626_v7, %v574_v8 }
 0x18b   : > { %v657_v15 = vsel %vm655_vm3, %v640_v11, 0.0  ;;  %v661_v24 = vsel %vm655_vm3, %v642_v14, 0.0 }
 0x18c   : > { %v658_v16 = vadd.f32 %v657_v15, %v656_v13  ;;  %v582_v18 = vpop.permute.xlu1 %581  ;;  %v578_v19 = vpop.permute.xlu0 %577 }
 0x18d   : > { %v643_v21 = vmul.f32 %v627_v12, %v578_v19  ;;  %v644_v25 = vmul.f32 %v628_v17, %v582_v18 }
 0x18e   : > { %v660_v22 = vadd.f32 %v659_v20, %v658_v16 }
 0x18f   : > { %v663_v30 = vsel %vm655_vm3, %v643_v21, 0.0  ;;  %v665_v34 = vsel %vm655_vm3, %v644_v25, 0.0  ;;  %v693_v21 = vld [vmem:[%s1308_s4] sm:$0x1] }
 0x190   : > { %v662_v26 = vadd.f32 %v661_v24, %v660_v22  ;;  %v590_v28 = vpop.permute.xlu1 %589  ;;  %v586_v29 = vpop.permute.xlu0 %585 }
 0x191   : > { %v645_v31 = vmul.f32 %v629_v23, %v586_v29  ;;  %v646_v35 = vmul.f32 %v630_v27, %v590_v28 }
 0x192   : > { %v664_v32 = vadd.f32 %v663_v30, %v662_v26 }
 0x193   : > { %v667_v40 = vsel %vm655_vm3, %v645_v31, 0.0  ;;  %v669_v44 = vsel %vm655_vm3, %v646_v35, 0.0 }
 0x194   : > { %v666_v36 = vadd.f32 %v665_v34, %v664_v32  ;;  %v598_v38 = vpop.permute.xlu1 %597  ;;  %v594_v39 = vpop.permute.xlu0 %593 }
 0x195   : > { %v647_v41 = vmul.f32 %v631_v33, %v594_v39  ;;  %v648_v45 = vmul.f32 %v632_v37, %v598_v38 }
 0x196   : > { %v668_v42 = vadd.f32 %v667_v40, %v666_v36 }
 0x197   : > { %v671_v50 = vsel %vm655_vm3, %v647_v41, 0.0  ;;  %v673_v54 = vsel %vm655_vm3, %v648_v45, 0.0 }
 0x198   : > { %v670_v46 = vadd.f32 %v669_v44, %v668_v42  ;;  %v606_v48 = vpop.permute.xlu1 %605  ;;  %v602_v49 = vpop.permute.xlu0 %601 }
 0x199   : > { %v649_v51 = vmul.f32 %v633_v43, %v602_v49  ;;  %v650_v55 = vmul.f32 %v634_v47, %v606_v48 }
 0x19a   : > { %v672_v52 = vadd.f32 %v671_v50, %v670_v46 }
 0x19b   : > { %v675_v60 = vsel %vm655_vm3, %v649_v51, 0.0  ;;  %v677_v0 = vsel %vm655_vm3, %v650_v55, 0.0 }
 0x19c   : > { %v674_v56 = vadd.f32 %v673_v54, %v672_v52  ;;  %v614_v58 = vpop.permute.xlu1 %613  ;;  %v610_v59 = vpop.permute.xlu0 %609 }
 0x19d   : > { %v651_v61 = vmul.f32 %v635_v53, %v610_v59  ;;  %v652_v1 = vmul.f32 %v636_v57, %v614_v58 }
 0x19e   : > { %v676_v62 = vadd.f32 %v675_v60, %v674_v56 }
 0x19f   : > { %v679_v6 = vsel %vm655_vm3, %v651_v61, 0.0  ;;  %v681_v9 = vsel %vm655_vm3, %v652_v1, 0.0 }
 0x1a0   : > { %v678_v2 = vadd.f32 %v677_v0, %v676_v62  ;;  %v622_v4 = vpop.permute.xlu1 %621  ;;  %v618_v5 = vpop.permute.xlu0 %617 }
 0x1a1   : > { %v653_v7 = vmul.f32 %v637_v63, %v618_v5  ;;  %v654_v10 = vmul.f32 %v638_v3, %v622_v4 }
 0x1a2   : > { %v680_v8 = vadd.f32 %v679_v6, %v678_v2 }
 0x1a3   : > { %v683_v12 = vsel %vm655_vm3, %v653_v7, 0.0  ;;  %v685_v14 = vsel %vm655_vm3, %v654_v10, 0.0 }
 0x1a4   : > { %v682_v11 = vadd.f32 %v681_v9, %v680_v8 }
 0x1a6   : > { %v684_v13 = vadd.f32 %v683_v12, %v682_v11 }
 0x1a8   : > { %v686_v15 = vadd.f32 %v685_v14, %v684_v13 }
 0x1aa   : > { %v687_v16 = vrot.slane %v686_v15, 4 }
 0x1ac   : > { %v688_v17 = vadd.f32 %v687_v16, %v686_v15 }
 0x1ae   : > { %v689_v18 = vrot.slane %v688_v17, 2 }
 0x1b0   : > { %v690_v19 = vadd.f32 %v689_v18, %v688_v17 }
 0x1b2   : > { %v691_v20 = vrot.slane %v690_v19, 1 }
 0x1b4   : > { %v692_v22 = vadd.f32 %v691_v20, %v690_v19 }
 0x1b6   : > { %v694_v23 = vadd.f32 %v693_v21, %v692_v22 }
 0x1b8   : > { %696 = vst.msk [vmem:[%s228_s8] sm:$0x1] %vm695_vm4, %v694_v23 }
 0x1b9   : > { %956 = shalt.err (!%p953_p5)
}
 0x1ba   : > { %s957_s17 = scalar_lea.hbm %s708_s12, 16  ;;  %s961_s27 = scalar_lea.hbm %s1309_s5, 32 }
 0x1bb   : > { %p958_p6 = scmp.ne.s32.totalorder %s708_s12, %s957_s17  ;;  %p962_p10 = scmp.lt.s32.totalorder %s708_s12, %s1309_s5 }
 0x1bc   : > { %p963_p11 = scmp.lt.s32.totalorder %s961_s27, %s957_s17 }
 0x1bd   : > { %p959_p7 = pnand %p958_p6, %p1094_p4 }
 0x1be   : > { %p964_p12 = por %p963_p11, %p962_p10 }
 0x1bf   : > { %p960_p9 = pneg %p959_p7 }
 0x1c1   : > { %p965_p13 = pnand %p964_p12, %p960_p9 }
 0x1c3   : > { %968 = shalt.err (!%p965_p13)
}
 0x1c4   : > { %859 = dma.vmem_to_hbm [thread:$0]  (%p1094_p4), %s711_s9, 16, %s708_s12, %s698_s13  }
 0x1c5 PF: > { %p865_p0 = scmp.ge.s32.totalorder %s1019_s23, 2  ;;  %s722_s8 = sand.u32 1, %s999_s18  }
 0x1c6   : > { %s723_s11 = scalar_lea.sflag [#allocation3], %s722_s8 }
 0x1c7   : > { %p862_p1 = pnand %p865_p0, %p1101_p8 }
 0x1c9   : > { %p863_p2 = pneg %p862_p1 }
 0x1cb   : > { %994 = dma.done.wait (%p863_p2), %s723_s11, 16  }
 0x1cc   : > { %996 = vsyncadd (%p863_p2), %s723_s11, 4294967280  ;;  %s18_s23 = sadd.s32 1, %s1019_s23   ;;  %s1312_s18 = smov %s1003_s19 }
 0x1cd   : > { %p15_p3 = scmp.ge.s32.totalorder %s18_s23, 4   ;;  %s1313_s19 = smov %s1007_s20 }
 0x1ce   : > { %s1314_s20 = smov %s1107_s6  ;;  %s1315_s21 = smov %s1015_s22 }
 0x1cf   : > { %s1316_s22 = smov %s1318_s26  ;;  %17 = sbr.rel (!%p15_p3) target bundleno = 4 (0x4), region = 75 }
 0x1d4   :  { %727 = vsyncpa [#allocation3], 1 }
 0x1d5   :  { %729 = vsyncpa [#allocation3 + $0x1], 1 }

</bundles_post_ra>
